<compile_context>
chip_gen: v5e
topology: v5e:2x2
jax: 0.10.0
libtpu: 0.0.40
codegen_flags: <defaults>
</compile_context>

<pallas_src>
import functools

import jax
import jax.numpy as jnp
from jax import lax
from jax.experimental import pallas as pl
from jax.experimental.pallas import tpu as pltpu


def _round_up(a, b):
    return ((a + b - 1) // b) * b


def _node_area_kernel(params_ref, ut_ref, out_ref, ox_ref, *,
                      xl, yl, bin_size_x, bin_size_y, nbx_pad, tby):
    """One (node-tile g, bin-y-chunk ky) grid step.

    params_ref: (8, TM) f32 -> rows 0..3 = x, y, size_x, size_y (rows 4..7 zero pad)
    ut_ref:     (TBY, NBX_pad) chunk of the transposed, zero-padded utilization map
    out_ref:    (1, TM) f32 accumulator (resident across the ky axis)
    ox_ref:     (NBX_pad, TM) VMEM scratch holding the x-overlap matrix for tile g
    """
    ky = pl.program_id(1)

    @pl.when(ky == 0)
    def _():
        # x-overlaps depend only on the node tile: compute once per tile g, cache in
        # VMEM scratch (reused as the matmul rhs by every bin-y chunk).
        p = params_ref[...]
        x_min = p[0:1, :]                                          # (1, TM)
        x_max = x_min + p[2:3, :]
        ix = lax.broadcasted_iota(jnp.int32, (nbx_pad, 1), 0).astype(jnp.float32)
        bin_xlo = xl + ix * bin_size_x
        bin_xhi = bin_xlo + bin_size_x
        ox = jnp.maximum(
            jnp.minimum(x_max, bin_xhi) - jnp.maximum(x_min, bin_xlo), 0.0)
        ox_ref[...] = ox.astype(ox_ref.dtype)                      # (NBX_pad, TM)
        out_ref[...] = jnp.zeros_like(out_ref)

    p = params_ref[...]
    y_min = p[1:2, :]                                              # (1, TM)
    y_max = y_min + p[3:4, :]

    # y-overlaps for this bin-y chunk only (TBY rows, tiny column-vector edge math).
    iy = (lax.broadcasted_iota(jnp.int32, (tby, 1), 0) + ky * tby).astype(jnp.float32)
    bin_ylo = yl + iy * bin_size_y
    bin_yhi = bin_ylo + bin_size_y
    oy = jnp.maximum(
        jnp.minimum(y_max, bin_yhi) - jnp.maximum(y_min, bin_ylo), 0.0)   # (TBY, TM)

    # partial_area[n] = sum_iy ( sum_ix U[iy, ix] * ox[ix, n] ) * oy[iy, n]
    pu = jnp.dot(ut_ref[...], ox_ref[...],
                 preferred_element_type=jnp.float32)                     # (TBY, TM)
    out_ref[...] += jnp.sum(pu * oy, axis=0, keepdims=True)              # (1, TM)


class ComputeNodeAreaFromPinMap:
    """JAX/Pallas port of dreamplace ComputeNodeAreaFromPinMap (forward only)."""

    def __init__(self, pin_weights, flat_node2pin_start_map, xl, yl, xh, yh,
                 num_movable_nodes, num_bins_x, num_bins_y, unit_pin_capacity,
                 tile_nodes=None, matmul_dtype=jnp.bfloat16,
                 max_bin_rows_per_step=512, vmem_limit_bytes=None):
        self.xl, self.yl, self.xh, self.yh = float(xl), float(yl), float(xh), float(yh)
        self.num_movable_nodes = int(num_movable_nodes)
        self.num_bins_x = int(num_bins_x)
        self.num_bins_y = int(num_bins_y)
        self.bin_size_x = (self.xh - self.xl) / self.num_bins_x
        self.bin_size_y = (self.yh - self.yl) / self.num_bins_y
        self.unit_pin_capacity = float(unit_pin_capacity)
        self.tile_nodes = tile_nodes                # None -> auto (512 small / 256 big)
        self.matmul_dtype = matmul_dtype            # bf16 => full-rate MXU on v6e/v7x
        self.max_bin_rows_per_step = int(max_bin_rows_per_step)
        self.vmem_limit_bytes = vmem_limit_bytes    # None -> auto-sized

        if pin_weights is not None:
            self.pin_weights = pin_weights
        elif flat_node2pin_start_map is not None:
            self.pin_weights = (
                flat_node2pin_start_map[1:self.num_movable_nodes + 1]
                - flat_node2pin_start_map[:self.num_movable_nodes])
        else:
            raise ValueError("either pin_weights or flat_node2pin_start_map is required")
        # TODO(synk): upstream adjust_node_area post-scales with
        # pin_weights / (node_size_x * node_size_y * unit_pin_capacity) outside this
        # forward; like the C++ forward, we return the raw route-map integral here.

    def __call__(self, pos, node_size_x, node_size_y, utilization_map):
        num_nodes = pos.shape[0] // 2
        n = self.num_movable_nodes
        nbx, nby = self.num_bins_x, self.num_bins_y

        mm_size = jnp.dtype(self.matmul_dtype).itemsize
        sub = 8 * (4 // mm_size)                 # sublane packing: f32->8, bf16->16

        # --- bin padding / bin-y chunking -------------------------------------
        nbx_pad = _round_up(nbx, 128)            # lane / contraction dim
        nby_sub = _round_up(nby, sub)            # only sublane padding, no 128 pad
        # Chunk rows so one resident U chunk stays around ~2 MiB.
        tby_cap = max(sub, ((2 * 1024 * 1024) // (nbx_pad * mm_size)) // sub * sub)
        tby = min(nby_sub, tby_cap, max(sub, _round_up(self.max_bin_rows_per_step, sub)))
        tby = max(sub, (tby // sub) * sub)
        nby_pad = _round_up(nby_sub, tby)
        ky_tiles = nby_pad // tby

        # --- node tiling -------------------------------------------------------
        if self.tile_nodes is None:
            tm = 512 if (nbx_pad <= 512 and nby_pad <= 512) else 256
        else:
            tm = _round_up(int(self.tile_nodes), 128)
        tm = max(128, min(tm, _round_up(n, 128)))
        n_pad = _round_up(n, tm)
        pad = n_pad - n
        num_tiles = n_pad // tm

        x = pos[:n].astype(jnp.float32)
        y = pos[num_nodes:num_nodes + n].astype(jnp.float32)
        sx = node_size_x[:n].astype(jnp.float32)
        sy = node_size_y[:n].astype(jnp.float32)

        # Pack the four per-node scalars (plus 4 zero rows -> aligned 8 sublanes) into
        # one lane-dense array: (num_tiles, 8, TM).  Zero-padded phantom nodes have
        # size 0 so their clamped overlap (and area) is exactly 0.
        def row(a):
            return jnp.pad(a, (0, pad))

        zeros = jnp.zeros((n_pad,), jnp.float32)
        packed = jnp.stack(
            [row(x), row(y), row(sx), row(sy), zeros, zeros, zeros, zeros], axis=0)
        packed = packed.reshape(8, num_tiles, tm).transpose(1, 0, 2)   # (G, 8, TM)

        # Transposed + zero-padded utilization map: padded bins contribute 0.
        u = jnp.asarray(utilization_map, jnp.float32)
        u_t = jnp.pad(u.T, ((0, nby_pad - nby), (0, nbx_pad - nbx)))
        u_t = u_t.astype(self.matmul_dtype)

        kernel = functools.partial(
            _node_area_kernel,
            xl=self.xl, yl=self.yl,
            bin_size_x=self.bin_size_x, bin_size_y=self.bin_size_y,
            nbx_pad=nbx_pad, tby=tby)

        # Auto-size scoped VMEM from the real footprint (defaults: 16 MiB on v5e,
        # 32 MiB on v6e/v7x).  Floor 32 MiB, cap 64 MiB (v7x physical).
        if self.vmem_limit_bytes is None:
            vmem_est = (2 * tby * nbx_pad * mm_size        # double-buffered U chunk
                        + nbx_pad * tm * mm_size           # ox scratch
                        + 2 * (8 * tm + tm) * 4            # params + out double buffers
                        + (2 * nbx_pad + 4 * tby) * tm * 4)  # in-kernel temporaries
            vmem_limit = int(min(64 * 1024 * 1024,
                                 max(32 * 1024 * 1024, int(1.5 * vmem_est))))
        else:
            vmem_limit = int(self.vmem_limit_bytes)

        # Unpadded dims for the scheduler hint; U is re-streamed per node tile only
        # when it is chunked along bin-y.
        u_stream_bytes = (num_tiles if ky_tiles > 1 else 1) * nby_pad * nbx_pad * mm_size
        cost = pl.CostEstimate(
            flops=2 * n * nbx * nby + 8 * n * (nbx + nby),
            transcendentals=0,
            bytes_accessed=8 * n_pad * 4 + u_stream_bytes + n_pad * 4)

        out = pl.pallas_call(
            kernel,
            out_shape=jax.ShapeDtypeStruct((num_tiles, tm), jnp.float32),
            grid_spec=pltpu.PrefetchScalarGridSpec(
                num_scalar_prefetch=0,
                grid=(num_tiles, ky_tiles),
                in_specs=[
                    pl.BlockSpec((None, 8, tm), lambda g, ky: (g, 0, 0)),
                    pl.BlockSpec((tby, nbx_pad), lambda g, ky: (ky, 0)),
                ],
                out_specs=pl.BlockSpec((1, tm), lambda g, ky: (g, 0)),
                scratch_shapes=[pltpu.VMEM((nbx_pad, tm), self.matmul_dtype)],
            ),
            compiler_params=pltpu.CompilerParams(
                dimension_semantics=("parallel", "arbitrary"),
                vmem_limit_bytes=vmem_limit),
            cost_estimate=cost,
        )(packed, u_t)

        return out.reshape(n_pad)[:n]


def _reference(pos, node_size_x, node_size_y, u, xl, yl, bsx, bsy, nbx, nby, n_mov):
    """Pure-JAX reference of the C++ launcher semantics."""
    num_nodes = pos.shape[0] // 2
    x = pos[:n_mov]
    y = pos[num_nodes:num_nodes + n_mov]
    x_max = x + node_size_x[:n_mov]
    y_max = y + node_size_y[:n_mov]
    ixs = jnp.arange(nbx, dtype=jnp.float32)
    iys = jnp.arange(nby, dtype=jnp.float32)
    ox = jnp.maximum(
        jnp.minimum(x_max[:, None], xl + (ixs + 1.0) * bsx)
        - jnp.maximum(x[:, None], xl + ixs * bsx), 0.0)
    oy = jnp.maximum(
        jnp.minimum(y_max[:, None], yl + (iys + 1.0) * bsy)
        - jnp.maximum(y[:, None], yl + iys * bsy), 0.0)
    return jnp.einsum('nx,xy,ny->n', ox, u, oy)


if __name__ == "__main__":
    key = jax.random.PRNGKey(0)
    k1, k2, k3, k4, k5, k6 = jax.random.split(key, 6)

    # Small synthetic placement instance.
    num_nodes = 220
    num_movable_nodes = 200
    num_bins_x = 32
    num_bins_y = 32
    xl, yl, xh, yh = 0.0, 0.0, 32.0, 32.0
    unit_pin_capacity = 1.5

    x_all = jax.random.uniform(k1, (num_nodes,), jnp.float32, 0.0, 30.0)
    y_all = jax.random.uniform(k2, (num_nodes,), jnp.float32, 0.0, 30.0)
    pos = jnp.concatenate([x_all, y_all])                         # (2 * num_nodes,)
    node_size_x = jax.random.uniform(k3, (num_nodes,), jnp.float32, 0.5, 3.0)
    node_size_y = jax.random.uniform(k4, (num_nodes,), jnp.float32, 0.5, 3.0)
    utilization_map = jax.random.uniform(k5, (num_bins_x, num_bins_y), jnp.float32)

    pin_counts = jax.random.randint(k6, (num_nodes,), 1, 8, jnp.int32)
    flat_node2pin_start_map = jnp.concatenate(
        [jnp.zeros((1,), jnp.int32), jnp.cumsum(pin_counts)])

    ref = _reference(pos, node_size_x, node_size_y, utilization_map,
                     xl, yl, (xh - xl) / num_bins_x, (yh - yl) / num_bins_y,
                     num_bins_x, num_bins_y, num_movable_nodes)
    ref = jax.block_until_ready(ref)

    common = dict(pin_weights=None,
                  flat_node2pin_start_map=flat_node2pin_start_map,
                  xl=xl, yl=yl, xh=xh, yh=yh,
                  num_movable_nodes=num_movable_nodes,
                  num_bins_x=num_bins_x, num_bins_y=num_bins_y,
                  unit_pin_capacity=unit_pin_capacity)

    # Fast path (bf16 MXU operands, f32 accumulation, auto tiles) — the default.
    module_bf16 = ComputeNodeAreaFromPinMap(**common)
    out_bf16 = jax.block_until_ready(
        module_bf16(pos, node_size_x, node_size_y, utilization_map))
    assert out_bf16.shape == (num_movable_nodes,)
    assert jnp.allclose(out_bf16, ref, rtol=2e-2, atol=2e-2), (
        float(jnp.max(jnp.abs(out_bf16 - ref))))

    # Exact f32 path, single bin-y chunk.
    module_f32 = ComputeNodeAreaFromPinMap(**common, matmul_dtype=jnp.float32)
    out_f32 = jax.block_until_ready(
        module_f32(pos, node_size_x, node_size_y, utilization_map))
    assert jnp.allclose(out_f32, ref, rtol=1e-4, atol=1e-3), (
        float(jnp.max(jnp.abs(out_f32 - ref))))

    # Exact f32 path with the bin-y reduction grid axis forced (max 16 bin rows per
    # step -> ky_tiles=2) and multiple node tiles (tile_nodes=128) to validate the
    # accumulator / ox-scratch-reuse path bit-for-bit.
    module_tiled = ComputeNodeAreaFromPinMap(**common, matmul_dtype=jnp.float32,
                                             max_bin_rows_per_step=16, tile_nodes=128)
    out_tiled = jax.block_until_ready(
        module_tiled(pos, node_size_x, node_size_y, utilization_map))
    assert jnp.allclose(out_tiled, ref, rtol=1e-4, atol=1e-3), (
        float(jnp.max(jnp.abs(out_tiled - ref))))

    print("KERNEL_OK")
</pallas_src>

<mosaic_0001>
module attributes {stable_mosaic.version = 11 : i64} {
  func.func @_node_area_kernel(%arg0: i32, %arg1: i32, %arg2: memref<1x8x256xf32, #tpu.memory_space<vmem>>, %arg3: memref<32x128xbf16, #tpu.memory_space<vmem>>, %arg4: memref<1x256xf32, #tpu.memory_space<vmem>>, %arg5: memref<128x256xbf16, #tpu.memory_space<vmem>>) attributes {dimension_semantics = [#tpu.dimension_semantics<parallel>, #tpu.dimension_semantics<arbitrary>], iteration_bounds = array<i64: 1, 1>, scalar_prefetch = 0 : i64, scratch_operands = 1 : i64, tpu.core_type = #tpu.core_type<tc>, window_params = [{transform_indices = @transform_0, window_bounds = array<i64: 1, 8, 256>}, {transform_indices = @transform_1, window_bounds = array<i64: 32, 128>}, {transform_indices = @transform_2, window_bounds = array<i64: 1, 256>}]} {
    %c0_i32 = arith.constant 0 : i32
    %0 = arith.cmpi eq, %arg1, %c0_i32 : i32
    %1 = arith.extui %0 : i1 to i32
    %c0_i32_0 = arith.constant 0 : i32
    %2 = arith.cmpi ne, %1, %c0_i32_0 : i32
    scf.if %2 {
      %c0_16 = arith.constant 0 : index
      %c0_17 = arith.constant 0 : index
      %c0_18 = arith.constant 0 : index
      %37 = vector.load %arg2[%c0_16, %c0_17, %c0_18] : memref<1x8x256xf32, #tpu.memory_space<vmem>>, vector<1x8x256xf32>
      %38 = vector.shape_cast %37 : vector<1x8x256xf32> to vector<8x256xf32>
      %39 = vector.extract_strided_slice %38 {offsets = [0, 0], sizes = [1, 256], strides = [1, 1]} : vector<8x256xf32> to vector<1x256xf32>
      %40 = vector.extract_strided_slice %38 {offsets = [2, 0], sizes = [1, 256], strides = [1, 1]} : vector<8x256xf32> to vector<1x256xf32>
      %41 = arith.addf %39, %40 : vector<1x256xf32>
      %42 = tpu.iota {dimensions = array<i32: 0>} : vector<128x1xi32>
      %43 = arith.sitofp %42 : vector<128x1xi32> to vector<128x1xf32>
      %cst_19 = arith.constant 1.000000e+00 : f32
      %44 = vector.broadcast %cst_19 : f32 to vector<128x1xf32>
      %45 = arith.mulf %43, %44 : vector<128x1xf32>
      %cst_20 = arith.constant 0.000000e+00 : f32
      %46 = vector.broadcast %cst_20 : f32 to vector<128x1xf32>
      %47 = arith.addf %46, %45 : vector<128x1xf32>
      %cst_21 = arith.constant 1.000000e+00 : f32
      %48 = vector.broadcast %cst_21 : f32 to vector<128x1xf32>
      %49 = arith.addf %47, %48 : vector<128x1xf32>
      %50 = vector.broadcast %41 : vector<1x256xf32> to vector<128x256xf32>
      %51 = vector.broadcast %49 : vector<128x1xf32> to vector<128x256xf32>
      %52 = arith.minimumf %50, %51 : vector<128x256xf32>
      %53 = vector.broadcast %39 : vector<1x256xf32> to vector<128x256xf32>
      %54 = vector.broadcast %47 : vector<128x1xf32> to vector<128x256xf32>
      %55 = arith.maximumf %53, %54 : vector<128x256xf32>
      %56 = arith.subf %52, %55 : vector<128x256xf32>
      %cst_22 = arith.constant 0.000000e+00 : f32
      %57 = vector.broadcast %cst_22 : f32 to vector<128x256xf32>
      %58 = arith.maximumf %56, %57 : vector<128x256xf32>
      %59 = arith.truncf %58 : vector<128x256xf32> to vector<128x256xbf16>
      %c0_23 = arith.constant 0 : index
      %c0_24 = arith.constant 0 : index
      %60 = vector.load %arg5[%c0_23, %c0_24] : memref<128x256xbf16, #tpu.memory_space<vmem>>, vector<128x256xbf16>
      tpu.vector_store %arg5[%c0_23, %c0_24], %59 {strides = array<i32>} : memref<128x256xbf16, #tpu.memory_space<vmem>>, vector<128x256xbf16>,
      %cst_25 = arith.constant 0.000000e+00 : f32
      %61 = vector.broadcast %cst_25 : f32 to vector<1x256xf32>
      %c0_26 = arith.constant 0 : index
      %c0_27 = arith.constant 0 : index
      %62 = vector.load %arg4[%c0_26, %c0_27] : memref<1x256xf32, #tpu.memory_space<vmem>>, vector<1x256xf32>
      tpu.vector_store %arg4[%c0_26, %c0_27], %61 {strides = array<i32>} : memref<1x256xf32, #tpu.memory_space<vmem>>, vector<1x256xf32>,
    } else {
    }
    %c0 = arith.constant 0 : index
    %c0_1 = arith.constant 0 : index
    %c0_2 = arith.constant 0 : index
    %3 = vector.load %arg2[%c0, %c0_1, %c0_2] : memref<1x8x256xf32, #tpu.memory_space<vmem>>, vector<1x8x256xf32>
    %4 = vector.shape_cast %3 : vector<1x8x256xf32> to vector<8x256xf32>
    %5 = vector.extract_strided_slice %4 {offsets = [1, 0], sizes = [1, 256], strides = [1, 1]} : vector<8x256xf32> to vector<1x256xf32>
    %6 = vector.extract_strided_slice %4 {offsets = [3, 0], sizes = [1, 256], strides = [1, 1]} : vector<8x256xf32> to vector<1x256xf32>
    %7 = arith.addf %5, %6 : vector<1x256xf32>
    %8 = tpu.iota {dimensions = array<i32: 0>} : vector<32x1xi32>
    %c32_i32 = arith.constant 32 : i32
    %9 = arith.muli %arg1, %c32_i32 : i32
    %10 = vector.broadcast %9 : i32 to vector<32x1xi32>
    %11 = arith.addi %8, %10 : vector<32x1xi32>
    %12 = arith.sitofp %11 : vector<32x1xi32> to vector<32x1xf32>
    %cst = arith.constant 1.000000e+00 : f32
    %13 = vector.broadcast %cst : f32 to vector<32x1xf32>
    %14 = arith.mulf %12, %13 : vector<32x1xf32>
    %cst_3 = arith.constant 0.000000e+00 : f32
    %15 = vector.broadcast %cst_3 : f32 to vector<32x1xf32>
    %16 = arith.addf %15, %14 : vector<32x1xf32>
    %cst_4 = arith.constant 1.000000e+00 : f32
    %17 = vector.broadcast %cst_4 : f32 to vector<32x1xf32>
    %18 = arith.addf %16, %17 : vector<32x1xf32>
    %19 = vector.broadcast %7 : vector<1x256xf32> to vector<32x256xf32>
    %20 = vector.broadcast %18 : vector<32x1xf32> to vector<32x256xf32>
    %21 = arith.minimumf %19, %20 : vector<32x256xf32>
    %22 = vector.broadcast %5 : vector<1x256xf32> to vector<32x256xf32>
    %23 = vector.broadcast %16 : vector<32x1xf32> to vector<32x256xf32>
    %24 = arith.maximumf %22, %23 : vector<32x256xf32>
    %25 = arith.subf %21, %24 : vector<32x256xf32>
    %cst_5 = arith.constant 0.000000e+00 : f32
    %26 = vector.broadcast %cst_5 : f32 to vector<32x256xf32>
    %27 = arith.maximumf %25, %26 : vector<32x256xf32>
    %c0_6 = arith.constant 0 : index
    %c0_7 = arith.constant 0 : index
    %28 = vector.load %arg3[%c0_6, %c0_7] : memref<32x128xbf16, #tpu.memory_space<vmem>>, vector<32x128xbf16>
    %c0_8 = arith.constant 0 : index
    %c0_9 = arith.constant 0 : index
    %29 = vector.load %arg5[%c0_8, %c0_9] : memref<128x256xbf16, #tpu.memory_space<vmem>>, vector<128x256xbf16>
    %cst_10 = arith.constant dense<0.000000e+00> : vector<32x256xf32>
    %30 = tpu.matmul %28, %29, %cst_10 {dimension_numbers = #tpu.dot_dimension_numbers<[1], [0], [0], [1], [0, 0, 1, 1], [], []>} : vector<32x128xbf16>, vector<128x256xbf16>, vector<32x256xf32> -> vector<32x256xf32>
    %c0_11 = arith.constant 0 : index
    %c0_12 = arith.constant 0 : index
    %31 = vector.load %arg4[%c0_11, %c0_12] : memref<1x256xf32, #tpu.memory_space<vmem>>, vector<1x256xf32>
    %32 = arith.mulf %30, %27 : vector<32x256xf32>
    %cst_13 = arith.constant dense<0.000000e+00> : vector<256xf32>
    %33 = vector.multi_reduction <add>, %32, %cst_13 [0] : vector<32x256xf32> to vector<256xf32>
    %34 = vector.shape_cast %33 : vector<256xf32> to vector<1x256xf32>
    %35 = arith.addf %31, %34 : vector<1x256xf32>
    %c0_14 = arith.constant 0 : index
    %c0_15 = arith.constant 0 : index
    %36 = vector.load %arg4[%c0_14, %c0_15] : memref<1x256xf32, #tpu.memory_space<vmem>>, vector<1x256xf32>
    tpu.vector_store %arg4[%c0_14, %c0_15], %35 {strides = array<i32>} : memref<1x256xf32, #tpu.memory_space<vmem>>, vector<1x256xf32>,
    return
  }
  func.func @transform_0(%arg0: i32, %arg1: i32) -> (i32, i32, i32) {
    %c0_i32 = arith.constant 0 : i32
    %c0_i32_0 = arith.constant 0 : i32
    %c0_i32_1 = arith.constant 0 : i32
    return %arg0, %c0_i32, %c0_i32_0 : i32, i32, i32
  }
  func.func @transform_1(%arg0: i32, %arg1: i32) -> (i32, i32) {
    %c0_i32 = arith.constant 0 : i32
    %c0_i32_0 = arith.constant 0 : i32
    return %arg1, %c0_i32 : i32, i32
  }
  func.func @transform_2(%arg0: i32, %arg1: i32) -> (i32, i32) {
    %c0_i32 = arith.constant 0 : i32
    %c0_i32_0 = arith.constant 0 : i32
    return %arg0, %c0_i32 : i32, i32
  }
}

</mosaic_0001>

<bundles_post_ra>
// kernel: tpu_custom_call.1
= control target key start
LH: loop header
LB: loop body
LE: loop exit
PB: predicated region body
PF: predicated region fallthrough
CT: control target
= control target key end

     0   :  { %7 = vsyncpa [#allocation4], 0  ;;  %s992_s0 = inlined_call_operand.hbm [shape: f32[1,8,256], index: 0, kind: input, shape index: {}]   ;;  %s993_s1 = inlined_call_operand.hbm [shape: bf16[32,128], index: 1, kind: input, shape index: {}]   ;;  %s994_s2 = inlined_call_operand.hbm [shape: f32[1,256], index: 2, kind: output, shape index: {}]  }
   0x1   :  { %8 = vsyncpa [#allocation7], 0 }
   0x2   :  { %9 = vsyncpa [#allocation5], 0  ;;  %s15_s11 = sshll.u32 %s992_s0, 4  ;;  %s756_s12 = smov [#allocation3]   ;;  %s16_s11 = int_to_ptr.hbm [resolvable:$true] %s15_s11 }
   0x3   :  { %s17_s13 = sshll.u32 %s756_s12, 4  ;;  %s25_s16 = sshll.u32 %s993_s1, 4  ;;  %s18_s13 = int_to_ptr.vmem [resolvable:$true] %s17_s13  ;;  %s26_s16 = int_to_ptr.hbm [resolvable:$true] %s25_s16 }
   0x4   :  { %20 = dma.hbm_to_vmem [thread:$0]  %s16_s11, 256, %s18_s13, [#allocation4]  }
   0x5   :  { %s757_s17 = smov [#allocation6]   ;;  %s758_s19 = smov 64  }
   0x6   :  { %s27_s18 = sshll.u32 %s757_s17, 4  ;;  %s759_s20 = smov 4   ;;  %s28_s18 = int_to_ptr.vmem [resolvable:$true] %s27_s18 }
   0x7   :  { %33 = dma.hbm_to_vmem [thread:$0]  %s26_s16, 256, %s28_s18, [#allocation7], %s758_s19, %s758_s19, %s759_s20  }
   0x8   :  { %750 = dma.done.wait [#allocation4], 256  }
   0x9   :  { %751 = vsyncadd [#allocation4], 4294967040 }
   0xa   :  { %752 = dma.done.wait [#allocation7], 256  }
   0xb   :  { %753 = vsyncadd [#allocation7], 4294967040  ;;  %v56_v0 = vlaneseq  ;;  %v794_v14 = vld [vmem:[#allocation3] sm:$0xff]  ;;  %v796_v15 = vld [vmem:[#allocation3 + $0x8] sm:$0xff]  ;;  %vm539_vm1 = vcmask 1040384   ;;  %s761_s0 = smov [#allocation8]  }
   0xc   :  { %v50_v20 = vrot.slane %v794_v14, 2  ;;  %v51_v21 = vrot.slane %v796_v15, 2  ;;  %v809_v24 = vperm.slane %v794_v14, 0  ;;  %v812_v25 = vperm.slane %v796_v15, 0  ;;  %s553_s1 = sshll.u32 %s761_s0, 4  ;;  %s555_s23 = sshll.u32 %s994_s2, 4  ;;  %s554_s1 = int_to_ptr.vmem [resolvable:$true] %s553_s1  ;;  %s556_s23 = int_to_ptr.hbm [resolvable:$true] %s555_s23 }
   0xd   :  { %v784_v1 = vshrl.u32 %v56_v0, 7  ;;  %vm972_vm0 = vcmp.lt.s32.totalorder %v56_v0, 256 }
   0xe   :  { %v815_v28 = vadd.f32 %v50_v20, %v794_v14  ;;  %v818_v29 = vadd.f32 %v51_v21, %v796_v15 }
   0xf   :  { %v71_v2 = vadd.s32 112, %v784_v1  ;;  %v72_v3 = vadd.s32 120, %v784_v1  ;;  %v69_v4 = vadd.s32 96, %v784_v1  ;;  %v70_v5 = vadd.s32 104, %v784_v1 }
  0x10   :  { %v67_v6 = vadd.s32 80, %v784_v1  ;;  %v68_v7 = vadd.s32 88, %v784_v1  ;;  %v65_v8 = vadd.s32 64, %v784_v1  ;;  %v66_v9 = vadd.s32 72, %v784_v1 }
  0x11   :  { %v87_v10 = vcvt.s32.f32 %v71_v2  ;;  %v88_v11 = vcvt.s32.f32 %v72_v3  ;;  %v85_v12 = vcvt.s32.f32 %v69_v4  ;;  %v86_v13 = vcvt.s32.f32 %v70_v5 }
  0x12   :  { %v798_v16 = vcvt.s32.f32 %v67_v6  ;;  %v800_v17 = vcvt.s32.f32 %v68_v7  ;;  %v802_v18 = vcvt.s32.f32 %v65_v8  ;;  %v804_v19 = vcvt.s32.f32 %v66_v9 }
  0x13   :  { %v119_v22 = vadd.f32 1.0, %v87_v10  ;;  %v120_v23 = vadd.f32 1.0, %v88_v11  ;;  %v117_v26 = vadd.f32 1.0, %v85_v12  ;;  %v118_v27 = vadd.f32 1.0, %v86_v13 }
  0x14   :  { %v115_v30 = vadd.f32 1.0, %v798_v16  ;;  %v116_v31 = vadd.f32 1.0, %v800_v17  ;;  %v185_v32 = vmax.f32 %v809_v24, %v87_v10  ;;  %v186_v33 = vmax.f32 %v812_v25, %v87_v10 }
  0x15   :  { %v187_v34 = vmax.f32 %v809_v24, %v88_v11  ;;  %v188_v35 = vmax.f32 %v812_v25, %v88_v11  ;;  %v827_v36 = vperm.slane %v815_v28, 0  ;;  %v830_v37 = vperm.slane %v818_v29, 0 }
  0x16   :  { %v181_v38 = vmax.f32 %v809_v24, %v85_v12  ;;  %v182_v39 = vmax.f32 %v812_v25, %v85_v12  ;;  %v183_v40 = vmax.f32 %v809_v24, %v86_v13  ;;  %v184_v41 = vmax.f32 %v812_v25, %v86_v13 }
  0x17   :  { %v177_v42 = vmax.f32 %v809_v24, %v798_v16  ;;  %v178_v43 = vmax.f32 %v812_v25, %v798_v16  ;;  %v151_v44 = vmin.f32 %v827_v36, %v119_v22  ;;  %v152_v45 = vmin.f32 %v830_v37, %v119_v22 }
  0x18   :  { %v153_v46 = vmin.f32 %v827_v36, %v120_v23  ;;  %v154_v47 = vmin.f32 %v830_v37, %v120_v23  ;;  %v147_v48 = vmin.f32 %v827_v36, %v117_v26  ;;  %v148_v49 = vmin.f32 %v830_v37, %v117_v26 }
  0x19   :  { %v149_v50 = vmin.f32 %v827_v36, %v118_v27  ;;  %v150_v51 = vmin.f32 %v830_v37, %v118_v27  ;;  %v217_v52 = vsub.f32 %v151_v44, %v185_v32  ;;  %v218_v53 = vsub.f32 %v152_v45, %v186_v33 }
  0x1a   :  { %v219_v54 = vsub.f32 %v153_v46, %v187_v34  ;;  %v220_v55 = vsub.f32 %v154_v47, %v188_v35  ;;  %v213_v56 = vsub.f32 %v147_v48, %v181_v38  ;;  %v214_v57 = vsub.f32 %v148_v49, %v182_v39 }
  0x1b   :  { %v215_v58 = vsub.f32 %v149_v50, %v183_v40  ;;  %v216_v59 = vsub.f32 %v150_v51, %v184_v41  ;;  %v249_v60 = vmax.f32 %v217_v52, 0.0  ;;  %v250_v61 = vmax.f32 %v218_v53, 0.0 }
  0x1c   :  { %v251_v62 = vmax.f32 %v219_v54, 0.0  ;;  %v252_v63 = vmax.f32 %v220_v55, 0.0  ;;  %v245_v2 = vmax.f32 %v213_v56, 0.0  ;;  %v246_v3 = vmax.f32 %v214_v57, 0.0 }
  0x1d   :  { %v247_v4 = vmax.f32 %v215_v58, 0.0  ;;  %v248_v5 = vmax.f32 %v216_v59, 0.0  ;;  %v267_v6 = vpack.c.bf16 %v250_v61, %v249_v60  ;;  %v143_v8 = vmin.f32 %v827_v36, %v115_v30 }
  0x1e   :  { %v268_v7 = vpack.c.bf16 %v252_v63, %v251_v62  ;;  %v144_v9 = vmin.f32 %v830_v37, %v115_v30  ;;  %v265_v10 = vpack.c.bf16 %v246_v3, %v245_v2  ;;  %v145_v12 = vmin.f32 %v827_v36, %v116_v31 }
  0x1f   :  { %v266_v11 = vpack.c.bf16 %v248_v5, %v247_v4  ;;  %v146_v13 = vmin.f32 %v830_v37, %v116_v31  ;;  %283 = vst [vmem:[#allocation2 + $0x70] sm:$0xff] %v267_v6  ;;  %v179_v16 = vmax.f32 %v809_v24, %v800_v17  ;;  %v180_v20 = vmax.f32 %v812_v25, %v800_v17 }
  0x20   :  { %v209_v21 = vsub.f32 %v143_v8, %v177_v42  ;;  %v210_v22 = vsub.f32 %v144_v9, %v178_v43  ;;  %284 = vst [vmem:[#allocation2 + $0x78] sm:$0xff] %v268_v7  ;;  %v113_v23 = vadd.f32 1.0, %v802_v18  ;;  %v114_v26 = vadd.f32 1.0, %v804_v19 }
  0x21   :  { %v173_v27 = vmax.f32 %v809_v24, %v802_v18  ;;  %v174_v30 = vmax.f32 %v812_v25, %v802_v18  ;;  %281 = vst [vmem:[#allocation2 + $0x60] sm:$0xff] %v265_v10  ;;  %v211_v31 = vsub.f32 %v145_v12, %v179_v16  ;;  %v212_v32 = vsub.f32 %v146_v13, %v180_v20 }
  0x22   :  { %v241_v33 = vmax.f32 %v209_v21, 0.0  ;;  %v242_v34 = vmax.f32 %v210_v22, 0.0  ;;  %282 = vst [vmem:[#allocation2 + $0x68] sm:$0xff] %v266_v11  ;;  %v139_v17 = vmin.f32 %v827_v36, %v113_v23  ;;  %v140_v35 = vmin.f32 %v830_v37, %v113_v23 }
  0x23   :  { %v141_v38 = vmin.f32 %v827_v36, %v114_v26  ;;  %v142_v39 = vmin.f32 %v830_v37, %v114_v26  ;;  %v243_v40 = vmax.f32 %v211_v31, 0.0  ;;  %v244_v41 = vmax.f32 %v212_v32, 0.0 }
  0x24   :  { %v263_v42 = vpack.c.bf16 %v242_v34, %v241_v33  ;;  %v175_v18 = vmax.f32 %v809_v24, %v804_v19  ;;  %v176_v43 = vmax.f32 %v812_v25, %v804_v19  ;;  %v205_v44 = vsub.f32 %v139_v17, %v173_v27 }
  0x25   :  { %v206_v45 = vsub.f32 %v140_v35, %v174_v30  ;;  %v63_v46 = vadd.s32 48, %v784_v1  ;;  %v264_v47 = vpack.c.bf16 %v244_v41, %v243_v40  ;;  %v64_v49 = vadd.s32 56, %v784_v1 }
  0x26   :  { %279 = vst [vmem:[#allocation2 + $0x50] sm:$0xff] %v263_v42  ;;  %v207_v48 = vsub.f32 %v141_v38, %v175_v18  ;;  %v61_v50 = vadd.s32 32, %v784_v1  ;;  %v632_v51 = vld [vmem:[#allocation2 + $0x70] sm:$0xf]  ;;  %v654_v52 = vld [vmem:[#allocation2 + $0x74] sm:$0xf]  ;;  %v208_v53 = vsub.f32 %v142_v39, %v176_v43  ;;  %v876_v61 = vcvt.s32.f32 %v784_v1 }
  0x27   :  { %v237_v54 = vmax.f32 %v205_v44, 0.0  ;;  %v238_v55 = vmax.f32 %v206_v45, 0.0  ;;  %v79_v56 = vcvt.s32.f32 %v63_v46  ;;  %v655_v57 = vld [vmem:[#allocation2 + $0x74] sm:$0xf0]  ;;  %v634_v58 = vld [vmem:[#allocation2 + $0x78] sm:$0xf0]  ;;  %v80_v59 = vcvt.s32.f32 %v64_v49 }
  0x28   :  { %280 = vst [vmem:[#allocation2 + $0x58] sm:$0xff] %v264_v47  ;;  %v239_v19 = vmax.f32 %v207_v48, 0.0  ;;  %v873_v60 = vcvt.s32.f32 %v61_v50  ;;  %v633_v62 = vor.u32 %v655_v57, %v632_v51  ;;  %v637_v63 = vor.u32 %v654_v52, %v634_v58  ;;  %v624_v2 = vld [vmem:[#allocation2 + $0x60] sm:$0xf]  ;;  %v652_v3 = vld [vmem:[#allocation2 + $0x64] sm:$0xf] }
  0x29   :  { %v240_v4 = vmax.f32 %v208_v53, 0.0  ;;  %v261_v5 = vpack.c.bf16 %v238_v55, %v237_v54  ;;  %v653_v6 = vld [vmem:[#allocation2 + $0x64] sm:$0xf0]  ;;  %v626_v7 = vld [vmem:[#allocation2 + $0x68] sm:$0xf0]  ;;  %v111_v8 = vadd.f32 1.0, %v79_v56  ;;  %v169_v10 = vmax.f32 %v809_v24, %v79_v56 }
  0x2a   :  { %v112_v9 = vadd.f32 1.0, %v80_v59  ;;  %v170_v11 = vmax.f32 %v812_v25, %v79_v56  ;;  %471 = vmatpush.bf16.msra.mxu0 %v633_v62  ;;  %656 = vmatpush.bf16.msra.mxu2 %v633_v62  ;;  %v625_v12 = vor.u32 %v653_v6, %v624_v2  ;;  %v629_v13 = vor.u32 %v652_v3, %v626_v7 }
  0x2b   :  { %v262_v16 = vpack.c.bf16 %v240_v4, %v239_v19  ;;  %277 = vst [vmem:[#allocation2 + $0x40] sm:$0xff] %v261_v5  ;;  %490 = vmatpush.bf16.msra.mxu1 %v637_v63  ;;  %664 = vmatpush.bf16.msra.mxu3 %v637_v63  ;;  %v135_v20 = vmin.f32 %v827_v36, %v111_v8  ;;  %v62_v23 = vadd.s32 40, %v784_v1  ;;  %v109_v33 = vadd.f32 1.0, %v873_v60 }
  0x2c   :  { %v136_v21 = vmin.f32 %v830_v37, %v111_v8  ;;  %v137_v22 = vmin.f32 %v827_v36, %v112_v9  ;;  %v138_v30 = vmin.f32 %v830_v37, %v112_v9  ;;  %v171_v31 = vmax.f32 %v809_v24, %v80_v59 }
  0x2d   :  { %v616_v26 = vld [vmem:[#allocation2 + $0x50] sm:$0xf]  ;;  %v650_v27 = vld [vmem:[#allocation2 + $0x54] sm:$0xf]  ;;  %278 = vst [vmem:[#allocation2 + $0x48] sm:$0xff] %v262_v16  ;;  %v172_v32 = vmax.f32 %v812_v25, %v80_v59  ;;  %v201_v34 = vsub.f32 %v135_v20, %v169_v10  ;;  %v78_v35 = vcvt.s32.f32 %v62_v23  ;;  %v165_v38 = vmax.f32 %v809_v24, %v873_v60 }
  0x2e   :  { %v202_v17 = vsub.f32 %v136_v21, %v170_v11  ;;  %472 = vmatpush.bf16.msra.mxu0 %v625_v12  ;;  %657 = vmatpush.bf16.msra.mxu2 %v625_v12  ;;  %v203_v41 = vsub.f32 %v137_v22, %v171_v31  ;;  %v131_v18 = vmin.f32 %v827_v36, %v109_v33  ;;  %v59_v43 = vadd.s32 16, %v784_v1 }
  0x2f   :  { %v651_v39 = vld [vmem:[#allocation2 + $0x54] sm:$0xf0]  ;;  %v618_v40 = vld [vmem:[#allocation2 + $0x58] sm:$0xf0]  ;;  %v204_v42 = vsub.f32 %v138_v30, %v172_v32  ;;  %491 = vmatpush.bf16.msra.mxu1 %v629_v13  ;;  %665 = vmatpush.bf16.msra.mxu3 %v629_v13  ;;  %v233_v46 = vmax.f32 %v201_v34, 0.0  ;;  %v110_v50 = vadd.f32 1.0, %v78_v35  ;;  %v132_v51 = vmin.f32 %v830_v37, %v109_v33 }
  0x30   :  { %v617_v44 = vor.u32 %v651_v39, %v616_v26  ;;  %v621_v45 = vor.u32 %v650_v27, %v618_v40  ;;  %v234_v47 = vmax.f32 %v202_v17, 0.0  ;;  %v235_v48 = vmax.f32 %v203_v41, 0.0 }
  0x31   :  { %v236_v49 = vmax.f32 %v204_v42, 0.0  ;;  %v166_v55 = vmax.f32 %v812_v25, %v873_v60  ;;  %v167_v56 = vmax.f32 %v809_v24, %v78_v35  ;;  %v168_v57 = vmax.f32 %v812_v25, %v78_v35 }
  0x32   :  { %v608_v52 = vld [vmem:[#allocation2 + $0x40] sm:$0xf]  ;;  %v648_v53 = vld [vmem:[#allocation2 + $0x44] sm:$0xf]  ;;  %v259_v54 = vpack.c.bf16 %v234_v47, %v233_v46  ;;  %473 = vmatpush.bf16.msra.mxu0 %v617_v44  ;;  %658 = vmatpush.bf16.msra.mxu2 %v617_v44  ;;  %v133_v19 = vmin.f32 %v827_v36, %v110_v50  ;;  %v134_v59 = vmin.f32 %v830_v37, %v110_v50  ;;  %v60_v62 = vadd.s32 24, %v784_v1 }
  0x33   :  { %v260_v58 = vpack.c.bf16 %v236_v49, %v235_v48  ;;  %492 = vmatpush.bf16.msra.mxu1 %v621_v45  ;;  %666 = vmatpush.bf16.msra.mxu3 %v621_v45  ;;  %v197_v3 = vsub.f32 %v131_v18, %v165_v38  ;;  %v198_v60 = vsub.f32 %v132_v51, %v166_v55  ;;  %v900_v4 = vcvt.s32.f32 %v59_v43 }
  0x34   :  { %v649_v63 = vld [vmem:[#allocation2 + $0x44] sm:$0xf0]  ;;  %v610_v2 = vld [vmem:[#allocation2 + $0x48] sm:$0xf0]  ;;  %275 = vst [vmem:[#allocation2 + $0x30] sm:$0xff] %v259_v54  ;;  %v58_v5 = vadd.s32 8, %v784_v1  ;;  %v199_v8 = vsub.f32 %v133_v19, %v167_v56  ;;  %v200_v9 = vsub.f32 %v134_v59, %v168_v57  ;;  %v903_v12 = vcvt.s32.f32 %v60_v62 }
  0x35   :  { %v609_v6 = vor.u32 %v649_v63, %v608_v52  ;;  %v613_v7 = vor.u32 %v648_v53, %v610_v2  ;;  %276 = vst [vmem:[#allocation2 + $0x38] sm:$0xff] %v260_v58  ;;  %v229_v10 = vmax.f32 %v197_v3, 0.0  ;;  %v230_v11 = vmax.f32 %v198_v60, 0.0 }
  0x36   :  { %v906_v13 = vadd.f32 1.0, %v900_v4  ;;  %v231_v16 = vmax.f32 %v199_v8, 0.0  ;;  %v232_v20 = vmax.f32 %v200_v9, 0.0  ;;  %v161_v21 = vmax.f32 %v809_v24, %v900_v4 }
  0x37   :  { %474 = vmatpush.bf16.msra.mxu0 %v609_v6  ;;  %659 = vmatpush.bf16.msra.mxu2 %v609_v6  ;;  %v162_v1 = vmax.f32 %v812_v25, %v900_v4  ;;  %v257_v22 = vpack.c.bf16 %v230_v11, %v229_v10  ;;  %v913_v23 = vadd.f32 1.0, %v903_v12  ;;  %v163_v31 = vmax.f32 %v809_v24, %v903_v12 }
  0x38   :  { %493 = vmatpush.bf16.msra.mxu1 %v613_v7  ;;  %667 = vmatpush.bf16.msra.mxu3 %v613_v7  ;;  %v127_v26 = vmin.f32 %v827_v36, %v906_v13  ;;  %v128_v27 = vmin.f32 %v830_v37, %v906_v13  ;;  %v258_v30 = vpack.c.bf16 %v232_v20, %v231_v16  ;;  %v923_v33 = vcvt.s32.f32 %v58_v5 }
  0x39   :  { %v164_v32 = vmax.f32 %v812_v25, %v903_v12  ;;  %273 = vst [vmem:[#allocation2 + $0x20] sm:$0xff] %v257_v22  ;;  %v129_v34 = vmin.f32 %v827_v36, %v913_v23  ;;  %v130_v17 = vmin.f32 %v830_v37, %v913_v23  ;;  %v930_v41 = vadd.f32 1.0, %v876_v61 }
  0x3a   :  { %v193_v35 = vsub.f32 %v127_v26, %v161_v21  ;;  %v194_v38 = vsub.f32 %v128_v27, %v162_v1  ;;  %274 = vst [vmem:[#allocation2 + $0x28] sm:$0xff] %v258_v30  ;;  %v157_v42 = vmax.f32 %v809_v24, %v876_v61  ;;  %v158_v18 = vmax.f32 %v812_v25, %v876_v61 }
  0x3b   :  { %v600_v39 = vld [vmem:[#allocation2 + $0x30] sm:$0xf]  ;;  %v646_v40 = vld [vmem:[#allocation2 + $0x34] sm:$0xf]  ;;  %v159_v43 = vmax.f32 %v809_v24, %v923_v33  ;;  %v195_v46 = vsub.f32 %v129_v34, %v163_v31  ;;  %v196_v47 = vsub.f32 %v130_v17, %v164_v32  ;;  %v939_v52 = vadd.f32 1.0, %v923_v33 }
  0x3c   :  { %v647_v44 = vld [vmem:[#allocation2 + $0x34] sm:$0xf0]  ;;  %v602_v45 = vld [vmem:[#allocation2 + $0x38] sm:$0xf0]  ;;  %v225_v48 = vmax.f32 %v193_v35, 0.0  ;;  %v226_v49 = vmax.f32 %v194_v38, 0.0  ;;  %v123_v53 = vmin.f32 %v827_v36, %v930_v41  ;;  %v124_v24 = vmin.f32 %v830_v37, %v930_v41 }
  0x3d   :  { %v601_v50 = vor.u32 %v647_v44, %v600_v39  ;;  %v605_v51 = vor.u32 %v646_v40, %v602_v45  ;;  %v227_v54 = vmax.f32 %v195_v46, 0.0  ;;  %v228_v55 = vmax.f32 %v196_v47, 0.0 }
  0x3e   :  { %v255_v56 = vpack.c.bf16 %v226_v49, %v225_v48  ;;  %v125_v57 = vmin.f32 %v827_v36, %v939_v52  ;;  %v126_v58 = vmin.f32 %v830_v37, %v939_v52  ;;  %v160_v19 = vmax.f32 %v812_v25, %v923_v33 }
  0x3f   :  { %475 = vmatpush.bf16.msra.mxu0 %v601_v50  ;;  %660 = vmatpush.bf16.msra.mxu2 %v601_v50  ;;  %v952_v59 = vperm.slane %v815_v28, 1  ;;  %v256_v62 = vpack.c.bf16 %v228_v55, %v227_v54  ;;  %v189_v63 = vsub.f32 %v123_v53, %v157_v42  ;;  %v190_v2 = vsub.f32 %v124_v24, %v158_v18  ;;  %v638_v42 = vld [vmem:[#allocation6] sm:$0xff]  ;;  %v639_v18 = vld [vmem:[#allocation6 + $0x8] sm:$0xff] }
  0x40   :  { %494 = vmatpush.bf16.msra.mxu1 %v605_v51  ;;  %668 = vmatpush.bf16.msra.mxu3 %v605_v51  ;;  %271 = vst [vmem:[#allocation2 + $0x10] sm:$0xff] %v255_v56  ;;  %v592_v3 = vld [vmem:[#allocation2 + $0x20] sm:$0xf]  ;;  %v644_v60 = vld [vmem:[#allocation2 + $0x24] sm:$0xf]  ;;  %v191_v5 = vsub.f32 %v125_v57, %v159_v43  ;;  %v192_v6 = vsub.f32 %v126_v58, %v160_v19  ;;  %v333_v36 = vperm.slane %v794_v14, 1 }
  0x41   :  { %v645_v7 = vld [vmem:[#allocation2 + $0x24] sm:$0xf0]  ;;  %v594_v37 = vld [vmem:[#allocation2 + $0x28] sm:$0xf0]  ;;  %272 = vst [vmem:[#allocation2 + $0x18] sm:$0xff] %v256_v62  ;;  %v221_v8 = vmax.f32 %v189_v63, 0.0  ;;  %v325_v25 = vmin.f32 %v952_v59, %v930_v41  ;;  %v329_v43 = vmin.f32 %v952_v59, %v906_v13  ;;  %v327_v46 = vmin.f32 %v952_v59, %v939_v52 }
  0x42   :  { %v593_v28 = vor.u32 %v645_v7, %v592_v3  ;;  %v597_v9 = vor.u32 %v644_v60, %v594_v37  ;;  %v222_v10 = vmax.f32 %v190_v2, 0.0  ;;  %v223_v11 = vmax.f32 %v191_v5, 0.0 }
  0x43   :  { %v224_v16 = vmax.f32 %v192_v6, 0.0  ;;  %v335_v20 = vmax.f32 %v333_v36, %v876_v61  ;;  %v339_v44 = vmax.f32 %v333_v36, %v900_v4  ;;  %v337_v47 = vmax.f32 %v333_v36, %v923_v33 }
  0x44   :  { %476 = vmatpush.bf16.msra.mxu0 %v593_v28  ;;  %661 = vmatpush.bf16.msra.mxu2 %v593_v28  ;;  %v253_v21 = vpack.c.bf16 %v222_v10, %v221_v8  ;;  %v331_v49 = vmin.f32 %v952_v59, %v913_v23  ;;  %v341_v50 = vmax.f32 %v333_v36, %v903_v12  ;;  %v324_v53 = vperm.slane %v818_v29, 1 }
  0x45   :  { %495 = vmatpush.bf16.msra.mxu1 %v597_v9  ;;  %669 = vmatpush.bf16.msra.mxu3 %v597_v9  ;;  %v254_v14 = vpack.c.bf16 %v224_v16, %v223_v11  ;;  %v958_v1 = vsub.f32 %v325_v25, %v335_v20  ;;  %v347_v45 = vsub.f32 %v329_v43, %v339_v44  ;;  %v334_v54 = vperm.slane %v796_v15, 1 }
  0x46   :  { %269 = vst [vmem:[#allocation2] sm:$0xff] %v253_v21  ;;  %v345_v48 = vsub.f32 %v327_v46, %v337_v47  ;;  %v349_v51 = vsub.f32 %v331_v49, %v341_v50  ;;  %v760_v56 = vmov 0.0   ;;  %v326_v24 = vmin.f32 %v324_v53, %v930_v41 }
  0x47   :  { %v584_v22 = vld [vmem:[#allocation2 + $0x10] sm:$0xf]  ;;  %v642_v26 = vld [vmem:[#allocation2 + $0x14] sm:$0xf]  ;;  %270 = vst [vmem:[#allocation2 + $0x8] sm:$0xff] %v254_v14  ;;  %v336_v57 = vmax.f32 %v334_v54, %v876_v61  ;;  %v328_v58 = vmin.f32 %v324_v53, %v939_v52  ;;  %v338_v19 = vmax.f32 %v334_v54, %v923_v33  ;;  %v330_v0 = vmin.f32 %v324_v53, %v906_v13 }
  0x48   :  { %v643_v27 = vld [vmem:[#allocation2 + $0x14] sm:$0xf0]  ;;  %v586_v30 = vld [vmem:[#allocation2 + $0x18] sm:$0xf0]  ;;  %289 = vst.msk [vmem:[#allocation8] sm:$0x3] %vm972_vm0, %v760_v56  ;;  %v340_v62 = vmax.f32 %v334_v54, %v900_v4  ;;  %v332_v2 = vmin.f32 %v324_v53, %v913_v23  ;;  %v342_v3 = vmax.f32 %v334_v54, %v903_v12 }
  0x49   :  { %v585_v31 = vor.u32 %v643_v27, %v584_v22  ;;  %v589_v32 = vor.u32 %v642_v26, %v586_v30  ;;  %v344_v15 = vsub.f32 %v326_v24, %v336_v57  ;;  %v346_v63 = vsub.f32 %v328_v58, %v338_v19 }
  0x4a   :  { %v351_v41 = vmax.f32 %v958_v1, 0.0  ;;  %v353_v60 = vmax.f32 %v345_v48, 0.0  ;;  %v348_v52 = vsub.f32 %v330_v0, %v340_v62  ;;  %v355_v33 = vmax.f32 %v347_v45, 0.0 }
  0x4b   :  { %477 = vmatpush.bf16.msra.mxu0 %v585_v31  ;;  %662 = vmatpush.bf16.msra.mxu2 %v585_v31  ;;  %v352_v61 = vmax.f32 %v344_v15, 0.0  ;;  %v354_v6 = vmax.f32 %v346_v63, 0.0  ;;  %v350_v37 = vsub.f32 %v332_v2, %v342_v3  ;;  %v357_v12 = vmax.f32 %v349_v51, 0.0 }
  0x4c   :  { %496 = vmatpush.bf16.msra.mxu1 %v589_v32  ;;  %670 = vmatpush.bf16.msra.mxu3 %v589_v32  ;;  %v356_v28 = vmax.f32 %v348_v52, 0.0 }
  0x4d   :  { %v576_v34 = vld [vmem:[#allocation2] sm:$0xf]  ;;  %v640_v17 = vld [vmem:[#allocation2 + $0x4] sm:$0xf]  ;;  %v358_v16 = vmax.f32 %v350_v37, 0.0 }
  0x4e   :  { %v641_v35 = vld [vmem:[#allocation2 + $0x4] sm:$0xf0]  ;;  %v578_v38 = vld [vmem:[#allocation2 + $0x8] sm:$0xf0] }
  0x4f   :  { %v577_v39 = vor.u32 %v641_v35, %v576_v34  ;;  %v581_v40 = vor.u32 %v640_v17, %v578_v38  ;;  %v509_v47 = vld [vmem:[#allocation8] sm:$0x3] }
  0x51   :  { %478 = vmatpush.bf16.msra.mxu0 %v577_v39  ;;  %663 = vmatpush.bf16.msra.mxu2 %v577_v39 }
  0x52   :  { %497 = vmatpush.bf16.msra.mxu1 %v581_v40  ;;  %671 = vmatpush.bf16.msra.mxu3 %v581_v40 }
  0x54   :  { %479 = vmatmul.bf16.vlgmr.msra.gmra.mxu0 %v638_v42  ;;  %484 = vmatmul.bf16.vlgmr.msra.gmra.mxu2 %v639_v18 }
  0x55   :  { %498 = vmatmul.bf16.vlgmr.msra.gmra.mxu1 %v638_v42  ;;  %503 = vmatmul.bf16.vlgmr.msra.gmra.mxu3 %v639_v18 }
  0xd1   :  { %v480_v29 = vpop.f32.mrf.mxu0 }
  0xd2   :  { %v499_v59 = vpop.f32.mrf.mxu1  ;;  %v510_v8 = vmul.f32 %v480_v29, %v351_v41 }
  0xd3   :  { %v511_v4 = vmul.f32 %v499_v59, %v352_v61 }
  0xd7   :  { %v485_v5 = vpop.f32.mrf.mxu2 }
  0xd8   :  { %v504_v36 = vpop.f32.mrf.mxu3  ;;  %v514_v23 = vmul.f32 %v485_v5, %v355_v33 }
  0xd9   :  { %v482_v7 = vpop.f32.mrf.mxu0  ;;  %v515_v21 = vmul.f32 %v504_v36, %v356_v28 }
  0xda   :  { %v512_v13 = vmul.f32 %v482_v7, %v353_v60  ;;  %v501_v25 = vpop.f32.mrf.mxu1 }
  0xdb   :  { %v513_v9 = vmul.f32 %v501_v25, %v354_v6 }
  0xdc   :  { %v518_v10 = vadd.f32 %v512_v13, %v510_v8 }
  0xdd   :  { %v527_v11 = vadd.f32 %v513_v9, %v511_v4 }
  0xde   :  { %v519_v20 = vadd.f32 %v518_v10, %v514_v23 }
  0xdf   :  { %v487_v14 = vpop.f32.mrf.mxu2  ;;  %v528_v27 = vadd.f32 %v527_v11, %v515_v21 }
  0xe0   :  { %v516_v1 = vmul.f32 %v487_v14, %v357_v12  ;;  %v506_v22 = vpop.f32.mrf.mxu3 }
  0xe1   :  { %v517_v26 = vmul.f32 %v506_v22, %v358_v16 }
  0xe2   :  { %v520_v30 = vadd.f32 %v519_v20, %v516_v1 }
  0xe3   :  { %v529_v31 = vadd.f32 %v528_v27, %v517_v26 }
  0xe4   :  { %v521_v32 = vrot.slane %v520_v30, 4 }
  0xe5   :  { %v530_v34 = vrot.slane %v529_v31, 4 }
  0xe6   :  { %v522_v17 = vadd.f32 %v521_v32, %v520_v30 }
  0xe7   :  { %v531_v35 = vadd.f32 %v530_v34, %v529_v31 }
  0xe8   :  { %v523_v38 = vrot.slane %v522_v17, 2 }
  0xe9   :  { %v532_v39 = vrot.slane %v531_v35, 2 }
  0xea   :  { %v524_v40 = vadd.f32 %v523_v38, %v522_v17 }
  0xeb   :  { %v533_v42 = vadd.f32 %v532_v39, %v531_v35 }
  0xec   :  { %v525_v18 = vrot.slane %v524_v40, 1 }
  0xed   :  { %v534_v43 = vrot.slane %v533_v42, 1 }
  0xee   :  { %v526_v45 = vadd.f32 %v525_v18, %v524_v40 }
  0xef   :  { %v535_v44 = vadd.f32 %v534_v43, %v533_v42 }
  0xf1   :  { %v538_v46 = vrot.slane %v535_v44, 7 }
  0xf3   :  { %v540_v48 = vsel %vm539_vm1, %v526_v45, %v538_v46 }
  0xf4   :  { %v542_v49 = vadd.f32 %v540_v48, %v509_v47 }
  0xf6   :  { %547 = vst.msk [vmem:[#allocation8] sm:$0x3] %vm972_vm0, %v542_v49 }
  0xf7   :  { %558 = dma.vmem_to_hbm [thread:$0]  %s554_s1, 32, %s556_s23, [#allocation5]  }
  0xf8   :  { %754 = dma.done.wait [#allocation5], 32  }
  0xf9   :  { %755 = vsyncadd [#allocation5], 4294967264 }
  0xfa   :  { %563 = vsyncpa [#allocation4], 1 }
  0xfb   :  { %564 = vsyncpa [#allocation7], 1 }
  0xfc   :  { %565 = vsyncpa [#allocation5], 1 }

</bundles_post_ra>
